<compile_context>
chip_gen: v7x
topology: tpu7x:2x2x1
jax: 0.10.0
libtpu: 0.0.40
codegen_flags: <defaults>
</compile_context>

<pallas_src>
import functools
import math

import jax
import jax.numpy as jnp
from jax.experimental import pallas as pl
from jax.experimental.pallas import tpu as pltpu


def _round_up(x, m):
    return ((x + m - 1) // m) * m


# ----------------------------- tiled linear -----------------------------

def _matmul_kernel(x_ref, w_ref, b_ref, o_ref, acc_ref, *, act):
    """One (tm, tn) output tile; K axis is the last ("arbitrary") grid axis."""
    k = pl.program_id(2)

    @pl.when(k == 0)
    def _():
        acc_ref[...] = jnp.zeros_like(acc_ref)

    acc_ref[...] += jnp.dot(x_ref[...], w_ref[...],
                            preferred_element_type=jnp.float32)

    @pl.when(k == pl.num_programs(2) - 1)
    def _():
        y = acc_ref[...] + b_ref[...]
        if act == "relu":
            y = jnp.maximum(y, 0.0)
        o_ref[...] = y.astype(o_ref.dtype)


def linear(x2d, w, b, act=None, tm=256, tk=512, tn=256):
    """y = x @ W + b (optional ReLU).  x:(M,K) W:(K,N) b:(N,) -> (M,N).

    Inputs are zero-padded to tile multiples (K/N lane-dense, multiple of 128);
    the result is sliced back to (M, N).  Default 256/512-class tiles target
    v6e's 2x256x256 MXU; on v7x (64 MiB VMEM) the min() clamp plus these sizes
    still fit comfortably for the model dims used here.
    """
    M, K = x2d.shape
    _, N = w.shape
    tm = min(tm, _round_up(M, 8))
    tk = min(tk, _round_up(K, 128))
    tn = min(tn, _round_up(N, 128))
    Mp, Kp, Np = _round_up(M, tm), _round_up(K, tk), _round_up(N, tn)

    xp = jnp.pad(x2d, ((0, Mp - M), (0, Kp - K)))
    wp = jnp.pad(w, ((0, Kp - K), (0, Np - N)))
    bp = jnp.pad(b, ((0, Np - N),)).reshape(1, Np)

    out = pl.pallas_call(
        functools.partial(_matmul_kernel, act=act),
        out_shape=jax.ShapeDtypeStruct((Mp, Np), jnp.float32),
        grid_spec=pltpu.PrefetchScalarGridSpec(
            num_scalar_prefetch=0,
            grid=(Mp // tm, Np // tn, Kp // tk),
            in_specs=[pl.BlockSpec((tm, tk), lambda i, j, k: (i, k)),
                      pl.BlockSpec((tk, tn), lambda i, j, k: (k, j)),
                      pl.BlockSpec((1, tn), lambda i, j, k: (0, j))],
            out_specs=pl.BlockSpec((tm, tn), lambda i, j, k: (i, j)),
            scratch_shapes=[pltpu.VMEM((tm, tn), jnp.float32)]),
        compiler_params=pltpu.CompilerParams(
            dimension_semantics=("parallel", "parallel", "arbitrary")),
    )(xp, wp, bp)
    return out[:M, :N]


# ------------------- fused attention block (per layer) -------------------

def _attn_block_kernel(x_ref, qkv_w_ref, qkv_b_ref, ow_ref, ob_ref,
                       g_ref, beta_ref, o_ref, *, nhead, eps):
    """LayerNorm1(x + OutProj(MHA(QKVProj(x)))) for one batch element."""
    x = x_ref[0]                                            # (S, d) f32
    S, d = x.shape
    dh = d // nhead
    scale = 1.0 / math.sqrt(dh)

    qkv = jnp.dot(x, qkv_w_ref[...],
                  preferred_element_type=jnp.float32) + qkv_b_ref[...]   # (S, 3d)

    heads = []
    for h in range(nhead):                                   # static loop
        q = qkv[:, h * dh:(h + 1) * dh] * scale
        k = qkv[:, d + h * dh:d + (h + 1) * dh]
        v = qkv[:, 2 * d + h * dh:2 * d + (h + 1) * dh]
        # scores = q @ k.T  (contract on head dim, no explicit transpose)
        s = jax.lax.dot_general(q, k, (((1,), (1,)), ((), ())),
                                preferred_element_type=jnp.float32)       # (S, S)
        m = jnp.max(s, axis=-1, keepdims=True)
        p = jnp.exp(s - m)
        denom = jnp.sum(p, axis=-1, keepdims=True)
        p = p * pl.reciprocal(denom, approx=True)            # EUP, not VALU div
        heads.append(jnp.dot(p, v, preferred_element_type=jnp.float32))
    attn = jnp.concatenate(heads, axis=-1)                   # (S, d)

    attn = jnp.dot(attn, ow_ref[...],
                   preferred_element_type=jnp.float32) + ob_ref[...]
    h_res = x + attn                                         # residual (x read once)
    mean = jnp.mean(h_res, axis=-1, keepdims=True)
    var = jnp.mean((h_res - mean) ** 2, axis=-1, keepdims=True)
    y = (h_res - mean) * jax.lax.rsqrt(var + eps)
    o_ref[0] = (y * g_ref[...] + beta_ref[...]).astype(o_ref.dtype)


def attn_block(x, lp, nhead, eps=1e-5):
    B, S, d = x.shape
    return pl.pallas_call(
        functools.partial(_attn_block_kernel, nhead=nhead, eps=eps),
        out_shape=jax.ShapeDtypeStruct((B, S, d), jnp.float32),
        grid_spec=pltpu.PrefetchScalarGridSpec(
            num_scalar_prefetch=0,
            grid=(B,),
            in_specs=[pl.BlockSpec((1, S, d), lambda b: (b, 0, 0)),
                      pl.BlockSpec((d, 3 * d), lambda b: (0, 0)),
                      pl.BlockSpec((1, 3 * d), lambda b: (0, 0)),
                      pl.BlockSpec((d, d), lambda b: (0, 0)),
                      pl.BlockSpec((1, d), lambda b: (0, 0)),
                      pl.BlockSpec((1, d), lambda b: (0, 0)),
                      pl.BlockSpec((1, d), lambda b: (0, 0))],
            out_specs=pl.BlockSpec((1, S, d), lambda b: (b, 0, 0))),
        compiler_params=pltpu.CompilerParams(
            dimension_semantics=("parallel",)),
    )(x, lp["qkv_w"], lp["qkv_b"].reshape(1, 3 * d),
      lp["attn_out_w"], lp["attn_out_b"].reshape(1, d),
      lp["ln1_g"].reshape(1, d), lp["ln1_b"].reshape(1, d))


# --------------------- fused FFN block (per layer) -----------------------

def _ffn_block_kernel(x_ref, w1_ref, b1_ref, w2_ref, b2_ref,
                      g_ref, beta_ref, o_ref, *, eps):
    """LayerNorm2(x + Linear2(ReLU(Linear1(x)))) for one row tile."""
    x = x_ref[...]                                           # (tm, d)
    hid = jnp.dot(x, w1_ref[...],
                  preferred_element_type=jnp.float32) + b1_ref[...]
    hid = jnp.maximum(hid, 0.0)
    ff = jnp.dot(hid, w2_ref[...],
                 preferred_element_type=jnp.float32) + b2_ref[...]
    h_res = x + ff                                           # residual (x read once)
    mean = jnp.mean(h_res, axis=-1, keepdims=True)
    var = jnp.mean((h_res - mean) ** 2, axis=-1, keepdims=True)
    y = (h_res - mean) * jax.lax.rsqrt(var + eps)
    o_ref[...] = (y * g_ref[...] + beta_ref[...]).astype(o_ref.dtype)


def ffn_block(x2d, lp, eps=1e-5, tm=256):
    M, d = x2d.shape
    ff = lp["l1_w"].shape[1]
    tm = min(tm, _round_up(M, 8))
    Mp = _round_up(M, tm)
    xp = jnp.pad(x2d, ((0, Mp - M), (0, 0)))
    out = pl.pallas_call(
        functools.partial(_ffn_block_kernel, eps=eps),
        out_shape=jax.ShapeDtypeStruct((Mp, d), jnp.float32),
        grid_spec=pltpu.PrefetchScalarGridSpec(
            num_scalar_prefetch=0,
            grid=(Mp // tm,),
            in_specs=[pl.BlockSpec((tm, d), lambda i: (i, 0)),
                      pl.BlockSpec((d, ff), lambda i: (0, 0)),
                      pl.BlockSpec((1, ff), lambda i: (0, 0)),
                      pl.BlockSpec((ff, d), lambda i: (0, 0)),
                      pl.BlockSpec((1, d), lambda i: (0, 0)),
                      pl.BlockSpec((1, d), lambda i: (0, 0)),
                      pl.BlockSpec((1, d), lambda i: (0, 0))],
            out_specs=pl.BlockSpec((tm, d), lambda i: (i, 0))),
        compiler_params=pltpu.CompilerParams(
            dimension_semantics=("parallel",)),
    )(xp, lp["l1_w"], lp["l1_b"].reshape(1, ff),
      lp["l2_w"], lp["l2_b"].reshape(1, d),
      lp["ln2_g"].reshape(1, d), lp["ln2_b"].reshape(1, d))
    return out[:M]


# ----------------------------- parameters -----------------------------

def init_params(key, input_dim, model_dim, output_dim, nhead, num_layers,
                dim_feedforward=2048):
    assert model_dim % nhead == 0
    ks = jax.random.split(key, 2 + 12 * num_layers + 4)
    it = iter(range(len(ks)))

    def w(shape):
        return (0.02 * jax.random.normal(ks[next(it)], shape)).astype(jnp.float32)

    params = {
        "model_dim": model_dim,
        "nhead": nhead,
        "in_w": w((input_dim, model_dim)),
        "in_b": w((model_dim,)),
        "out_w": w((model_dim, output_dim)),
        "out_b": w((output_dim,)),
        "layers": [],
    }
    for _ in range(num_layers):
        params["layers"].append({
            "qkv_w": w((model_dim, 3 * model_dim)),       # in_proj (transposed)
            "qkv_b": w((3 * model_dim,)),
            "attn_out_w": w((model_dim, model_dim)),      # out_proj
            "attn_out_b": w((model_dim,)),
            "l1_w": w((model_dim, dim_feedforward)),      # linear1
            "l1_b": w((dim_feedforward,)),
            "l2_w": w((dim_feedforward, model_dim)),      # linear2
            "l2_b": w((model_dim,)),
            "ln1_g": jnp.ones((model_dim,), jnp.float32),
            "ln1_b": w((model_dim,)),
            "ln2_g": jnp.ones((model_dim,), jnp.float32),
            "ln2_b": w((model_dim,)),
        })
    return params


# ----------------------------- forward pass -----------------------------

def universal_transformer_forward(params, src):
    """src: (B, S, input_dim) f32 -> (out (B, output_dim), activations dict)."""
    B, S, in_dim = src.shape
    d = params["model_dim"]
    H = params["nhead"]

    x2d = linear(src.reshape(B * S, in_dim), params["in_w"], params["in_b"])
    x = x2d.reshape(B, S, d)

    activations = {}                                   # mirrors self.activations
    for i, lp in enumerate(params["layers"]):
        x = attn_block(x, lp, H)                       # fused attention half
        x2d = ffn_block(x.reshape(B * S, d), lp)       # fused FFN half
        x = x2d.reshape(B, S, d)
        activations[f"encoder_layer_{i}"] = x

    last_token = x[:, -1, :]                           # (B, d)
    out = linear(last_token, params["out_w"], params["out_b"])
    return out, activations


# ----------------------------- pure-JAX reference -----------------------------

def _ln_ref(h, g, b, eps=1e-5):
    m = h.mean(-1, keepdims=True)
    v = ((h - m) ** 2).mean(-1, keepdims=True)
    return (h - m) * jax.lax.rsqrt(v + eps) * g + b


def reference_forward(params, src):
    B, S, _ = src.shape
    d = params["model_dim"]
    H = params["nhead"]
    dh = d // H
    x = (src.reshape(B * S, -1) @ params["in_w"] + params["in_b"]).reshape(B, S, d)
    for lp in params["layers"]:
        qkv = x @ lp["qkv_w"] + lp["qkv_b"]
        q, k, v = jnp.split(qkv, 3, axis=-1)
        q = q.reshape(B, S, H, dh).transpose(0, 2, 1, 3)
        k = k.reshape(B, S, H, dh).transpose(0, 2, 1, 3)
        v = v.reshape(B, S, H, dh).transpose(0, 2, 1, 3)
        s = jnp.einsum("bhqd,bhkd->bhqk", q, k) / math.sqrt(dh)
        p = jax.nn.softmax(s, axis=-1)
        a = jnp.einsum("bhqk,bhkd->bhqd", p, v).transpose(0, 2, 1, 3).reshape(B, S, d)
        a = a @ lp["attn_out_w"] + lp["attn_out_b"]
        x = _ln_ref(x + a, lp["ln1_g"], lp["ln1_b"])
        ff = jnp.maximum(x @ lp["l1_w"] + lp["l1_b"], 0.0) @ lp["l2_w"] + lp["l2_b"]
        x = _ln_ref(x + ff, lp["ln2_g"], lp["ln2_b"])
    return x[:, -1, :] @ params["out_w"] + params["out_b"]


# ----------------------------- main -----------------------------

if __name__ == "__main__":
    B, S = 2, 8
    input_dim, model_dim, output_dim = 16, 32, 8
    nhead, num_layers = 4, 2

    key = jax.random.PRNGKey(0)
    k_param, k_src = jax.random.split(key)
    params = init_params(k_param, input_dim, model_dim, output_dim, nhead, num_layers)
    src = jax.random.normal(k_src, (B, S, input_dim), dtype=jnp.float32)

    out, acts = universal_transformer_forward(params, src)
    out = jax.block_until_ready(out)

    assert out.shape == (B, output_dim), out.shape
    assert all(a.shape == (B, S, model_dim) for a in acts.values())

    ref = jax.block_until_ready(reference_forward(params, src))
    max_err = float(jnp.max(jnp.abs(out - ref)))
    assert max_err < 2e-2, f"kernel vs reference max abs err {max_err}"

    print("KERNEL_OK")
</pallas_src>

<mosaic_0001>
module attributes {stable_mosaic.version = 11 : i64} {
  func.func @_matmul_kernel(%arg0: i32, %arg1: i32, %arg2: i32, %arg3: memref<16x128xf32, #tpu.memory_space<vmem>>, %arg4: memref<128x128xf32, #tpu.memory_space<vmem>>, %arg5: memref<1x128xf32, #tpu.memory_space<vmem>>, %arg6: memref<16x128xf32, #tpu.memory_space<vmem>>, %arg7: memref<16x128xf32, #tpu.memory_space<vmem>>) attributes {dimension_semantics = [#tpu.dimension_semantics<parallel>, #tpu.dimension_semantics<parallel>, #tpu.dimension_semantics<arbitrary>], iteration_bounds = array<i64: 1, 1, 1>, scalar_prefetch = 0 : i64, scratch_operands = 1 : i64, tpu.core_type = #tpu.core_type<tc>, window_params = [{transform_indices = @transform_0, window_bounds = array<i64: 16, 128>}, {transform_indices = @transform_1, window_bounds = array<i64: 128, 128>}, {transform_indices = @transform_2, window_bounds = array<i64: 1, 128>}, {transform_indices = @transform_3, window_bounds = array<i64: 16, 128>}]} {
    %c0_i32 = arith.constant 0 : i32
    %0 = arith.cmpi eq, %arg2, %c0_i32 : i32
    %1 = arith.extui %0 : i1 to i32
    %c0_i32_0 = arith.constant 0 : i32
    %2 = arith.cmpi ne, %1, %c0_i32_0 : i32
    scf.if %2 {
      %cst_10 = arith.constant 0.000000e+00 : f32
      %12 = vector.broadcast %cst_10 : f32 to vector<16x128xf32>
      %c0_11 = arith.constant 0 : index
      %c0_12 = arith.constant 0 : index
      %13 = vector.load %arg7[%c0_11, %c0_12] : memref<16x128xf32, #tpu.memory_space<vmem>>, vector<16x128xf32>
      tpu.vector_store %arg7[%c0_11, %c0_12], %12 {strides = array<i32>} : memref<16x128xf32, #tpu.memory_space<vmem>>, vector<16x128xf32>,
    } else {
    }
    %c0 = arith.constant 0 : index
    %c0_1 = arith.constant 0 : index
    %3 = vector.load %arg7[%c0, %c0_1] : memref<16x128xf32, #tpu.memory_space<vmem>>, vector<16x128xf32>
    %c0_2 = arith.constant 0 : index
    %c0_3 = arith.constant 0 : index
    %4 = vector.load %arg3[%c0_2, %c0_3] : memref<16x128xf32, #tpu.memory_space<vmem>>, vector<16x128xf32>
    %c0_4 = arith.constant 0 : index
    %c0_5 = arith.constant 0 : index
    %5 = vector.load %arg4[%c0_4, %c0_5] : memref<128x128xf32, #tpu.memory_space<vmem>>, vector<128x128xf32>
    %cst = arith.constant dense<0.000000e+00> : vector<16x128xf32>
    %6 = tpu.matmul %4, %5, %cst {dimension_numbers = #tpu.dot_dimension_numbers<[1], [0], [0], [1], [0, 0, 1, 1], [], []>} : vector<16x128xf32>, vector<128x128xf32>, vector<16x128xf32> -> vector<16x128xf32>
    %7 = arith.addf %3, %6 : vector<16x128xf32>
    %c0_6 = arith.constant 0 : index
    %c0_7 = arith.constant 0 : index
    %8 = vector.load %arg7[%c0_6, %c0_7] : memref<16x128xf32, #tpu.memory_space<vmem>>, vector<16x128xf32>
    tpu.vector_store %arg7[%c0_6, %c0_7], %7 {strides = array<i32>} : memref<16x128xf32, #tpu.memory_space<vmem>>, vector<16x128xf32>,
    %c0_i32_8 = arith.constant 0 : i32
    %9 = arith.cmpi eq, %arg2, %c0_i32_8 : i32
    %10 = arith.extui %9 : i1 to i32
    %c0_i32_9 = arith.constant 0 : i32
    %11 = arith.cmpi ne, %10, %c0_i32_9 : i32
    scf.if %11 {
      %c0_10 = arith.constant 0 : index
      %c0_11 = arith.constant 0 : index
      %12 = vector.load %arg7[%c0_10, %c0_11] : memref<16x128xf32, #tpu.memory_space<vmem>>, vector<16x128xf32>
      %c0_12 = arith.constant 0 : index
      %c0_13 = arith.constant 0 : index
      %13 = vector.load %arg5[%c0_12, %c0_13] : memref<1x128xf32, #tpu.memory_space<vmem>>, vector<1x128xf32>
      %14 = vector.broadcast %13 : vector<1x128xf32> to vector<16x128xf32>
      %15 = arith.addf %12, %14 : vector<16x128xf32>
      %c0_14 = arith.constant 0 : index
      %c0_15 = arith.constant 0 : index
      %16 = vector.load %arg6[%c0_14, %c0_15] : memref<16x128xf32, #tpu.memory_space<vmem>>, vector<16x128xf32>
      tpu.vector_store %arg6[%c0_14, %c0_15], %15 {strides = array<i32>} : memref<16x128xf32, #tpu.memory_space<vmem>>, vector<16x128xf32>,
    } else {
    }
    return
  }
  func.func @transform_0(%arg0: i32, %arg1: i32, %arg2: i32) -> (i32, i32) {
    %c0_i32 = arith.constant 0 : i32
    return %arg0, %arg2 : i32, i32
  }
  func.func @transform_1(%arg0: i32, %arg1: i32, %arg2: i32) -> (i32, i32) {
    %c0_i32 = arith.constant 0 : i32
    return %arg2, %arg1 : i32, i32
  }
  func.func @transform_2(%arg0: i32, %arg1: i32, %arg2: i32) -> (i32, i32) {
    %c0_i32 = arith.constant 0 : i32
    %c0_i32_0 = arith.constant 0 : i32
    return %c0_i32, %arg1 : i32, i32
  }
  func.func @transform_3(%arg0: i32, %arg1: i32, %arg2: i32) -> (i32, i32) {
    %c0_i32 = arith.constant 0 : i32
    return %arg0, %arg1 : i32, i32
  }
}

</mosaic_0001>

<bundles_post_ra>
// kernel: tpu_custom_call.1
= control target key start
LH: loop header
LB: loop body
LE: loop exit
PB: predicated region body
PF: predicated region fallthrough
CT: control target
= control target key end

     0   :  { %8 = vsyncpa [#allocation4], 0  ;;  %s418_s0 = inlined_call_operand.hbm [shape: f32[16,128], index: 0, kind: input, shape index: {}]   ;;  %s419_s1 = inlined_call_operand.hbm [shape: f32[128,128], index: 1, kind: input, shape index: {}]   ;;  %s420_s2 = inlined_call_operand.vmem [shape: f32[1,128], index: 2, kind: input, shape index: {}]   ;;  %s421_s3 = inlined_call_operand.hbm [shape: f32[16,128], index: 3, kind: output, shape index: {}]  }
   0x1   :  { %9 = vsyncpa [#allocation7], 0 }
   0x2   :  { %10 = vsyncpa [#allocation5], 0  ;;  %s345_s12 = smov [#allocation3]   ;;  %s273_s16 = scalar_lea.hbm %s418_s0, 256 }
   0x3   :  { %s16_s13 = sshll.u32 %s345_s12, 4  ;;  %p274_p0 = scmp.ne.s32.totalorder %s418_s0, %s273_s16  ;;  %s17_s13 = int_to_ptr.vmem [resolvable:$true] %s16_s13 }
   0x4   :  { %p277_p1 = scmp.lt.u32.totalorder %s273_s16, %s418_s0 }
   0x6   :  { %p279_p2 = pnand %p277_p1, %p274_p0 }
   0x8   :  { %282 = shalt.err (!%p279_p2)
}
   0x9   :  { %s283_s21 = scalar_lea.vmem %s17_s13, 256  ;;  %p288_p4 = scmp.lt.s32.totalorder %s17_s13, %s17_s13 }
   0xa   :  { %p284_p3 = scmp.ne.s32.totalorder %s17_s13, %s283_s21  ;;  %p289_p5 = scmp.lt.s32.totalorder %s283_s21, %s283_s21 }
   0xc   :  { %p290_p6 = por %p289_p5, %p288_p4 }
   0xe   :  { %p291_p7 = pnand %p290_p6, %p284_p3 }
  0x10   :  { %294 = shalt.err (!%p291_p7)
}
  0x11   :  { %s346_s22 = smov 128   ;;  %s347_s23 = smov 8  }
  0x12   :  { %22 = dma.hbm_to_vmem [thread:$0]  %s418_s0, 256, %s17_s13, [#allocation4], %s346_s22, %s346_s22, %s347_s23  }
  0x13   :  { %s348_s26 = smov [#allocation6]   ;;  %s295_s30 = scalar_lea.hbm %s419_s1, 2048 }
  0x14   :  { %s28_s27 = sshll.u32 %s348_s26, 4  ;;  %p296_p8 = scmp.ne.s32.totalorder %s419_s1, %s295_s30  ;;  %s29_s27 = int_to_ptr.vmem [resolvable:$true] %s28_s27 }
  0x15   :  { %p299_p9 = scmp.lt.u32.totalorder %s295_s30, %s419_s1 }
  0x17   :  { %p301_p10 = pnand %p299_p9, %p296_p8 }
  0x19   :  { %304 = shalt.err (!%p301_p10)
}
  0x1a   :  { %s305_s8 = scalar_lea.vmem %s29_s27, 2048  ;;  %p310_p12 = scmp.lt.s32.totalorder %s29_s27, %s29_s27 }
  0x1b   :  { %p306_p11 = scmp.ne.s32.totalorder %s29_s27, %s305_s8  ;;  %p311_p13 = scmp.lt.s32.totalorder %s305_s8, %s305_s8 }
  0x1d   :  { %p312_p0 = por %p311_p13, %p310_p12 }
  0x1f   :  { %p313_p1 = pnand %p312_p0, %p306_p11 }
  0x21   :  { %316 = shalt.err (!%p313_p1)
}
  0x22   :  { %34 = dma.hbm_to_vmem [thread:$0]  %s419_s1, 2048, %s29_s27, [#allocation7], %s346_s22, %s346_s22, %s347_s23  }
  0x23   :  { %339 = dma.done.wait [#allocation4], 256  }
  0x24   :  { %340 = vsyncadd [#allocation4], 4294967040 }
  0x25   :  { %341 = dma.done.wait [#allocation7], 2048  }
  0x26   :  { %342 = vsyncadd [#allocation7], 4294965248  ;;  %v53_v0 = vld [vmem:[#allocation6] sm:$0xff]  ;;  %v54_v1 = vld [vmem:[#allocation6 + $0x8] sm:$0xff]  ;;  %s349_s11 = smov [#allocation8]  }
  0x27   :  { %v55_v2 = vld [vmem:[#allocation6 + $0x10] sm:$0xff]  ;;  %v236_v3 = vpack.c.bf16 %v54_v1, %v53_v0  ;;  %v56_v4 = vld [vmem:[#allocation6 + $0x18] sm:$0xff]  ;;  %v57_v6 = vld [vmem:[#allocation6 + $0x20] sm:$0xff]  ;;  %s169_s12 = sshll.u32 %s349_s11, 4  ;;  %s170_s12 = int_to_ptr.vmem [resolvable:$true] %s169_s12 }
  0x28   :  { %v240_v5 = vpack.c.bf16 %v56_v4, %v55_v2  ;;  %v58_v7 = vld [vmem:[#allocation6 + $0x28] sm:$0xff]  ;;  %v51_v9 = vld [vmem:[#allocation3] sm:$0xff]  ;;  %v60_v11 = vld [vmem:[#allocation6 + $0x38] sm:$0xff]  ;;  %s317_s13 = scalar_lea.vmem %s170_s12, 256  ;;  %p322_p3 = scmp.lt.s32.totalorder %s170_s12, %s170_s12 }
  0x29   :  { %237 = vmatprep.subr.bf16.mxu0 %v236_v3  ;;  %v244_v8 = vpack.c.bf16 %v58_v7, %v57_v6  ;;  %v59_v10 = vld [vmem:[#allocation6 + $0x30] sm:$0xff]  ;;  %233 = vmatprep.mubr.f32.mxu0 %v51_v9  ;;  %v61_v13 = vld [vmem:[#allocation6 + $0x40] sm:$0xff]  ;;  %v62_v14 = vld [vmem:[#allocation6 + $0x48] sm:$0xff]  ;;  %p318_p2 = scmp.ne.s32.totalorder %s170_s12, %s317_s13  ;;  %p323_p4 = scmp.lt.s32.totalorder %s317_s13, %s317_s13 }
  0x2a   :  { %239 = vmatpush3.bf16.msra.mxu0 %v236_v3  ;;  %v248_v12 = vpack.c.bf16 %v60_v11, %v59_v10  ;;  %v252_v15 = vpack.c.bf16 %v62_v14, %v61_v13  ;;  %v63_v16 = vld [vmem:[#allocation6 + $0x50] sm:$0xff]  ;;  %v64_v17 = vld [vmem:[#allocation6 + $0x58] sm:$0xff]  ;;  %v65_v19 = vld [vmem:[#allocation6 + $0x60] sm:$0xff] }
  0x2b   :  { %241 = vmatprep.subr.bf16.mxu0 %v240_v5  ;;  %v256_v18 = vpack.c.bf16 %v64_v17, %v63_v16  ;;  %v66_v20 = vld [vmem:[#allocation6 + $0x68] sm:$0xff]  ;;  %v67_v22 = vld [vmem:[#allocation6 + $0x70] sm:$0xff]  ;;  %v68_v23 = vld [vmem:[#allocation6 + $0x78] sm:$0xff]  ;;  %p324_p5 = por %p323_p4, %p322_p3 }
  0x2c   :  { %v260_v21 = vpack.c.bf16 %v66_v20, %v65_v19  ;;  %v264_v24 = vpack.c.bf16 %v68_v23, %v67_v22  ;;  %v52_v25 = vld [vmem:[#allocation3 + $0x8] sm:$0xff]  ;;  %v182_v26 = vld [vmem:[%s420_s2] ss:$0 sm:$0xff] }
  0x2d   :  { %p325_p6 = pnand %p324_p5, %p318_p2 }
  0x2e   :  { %243 = vmatpush3.bf16.msra.mxu0 %v240_v5 }
  0x2f   :  { %245 = vmatprep.subr.bf16.mxu0 %v244_v8 }
  0x32   :  { %247 = vmatpush3.bf16.msra.mxu0 %v244_v8 }
  0x33   :  { %249 = vmatprep.subr.bf16.mxu0 %v248_v12 }
  0x36   :  { %251 = vmatpush3.bf16.msra.mxu0 %v248_v12 }
  0x37   :  { %253 = vmatprep.subr.bf16.mxu0 %v252_v15 }
  0x3a   :  { %255 = vmatpush3.bf16.msra.mxu0 %v252_v15 }
  0x3b   :  { %257 = vmatprep.subr.bf16.mxu0 %v256_v18 }
  0x3e   :  { %259 = vmatpush3.bf16.msra.mxu0 %v256_v18 }
  0x3f   :  { %261 = vmatprep.subr.bf16.mxu0 %v260_v21 }
  0x42   :  { %263 = vmatpush3.bf16.msra.mxu0 %v260_v21 }
  0x43   :  { %265 = vmatprep.subr.bf16.mxu0 %v264_v24 }
  0x46   :  { %267 = vmatpush3.bf16.msra.mxu0 %v264_v24 }
  0x49   :  { %234 = vmatmul.mubr.f32.vlgmr.msra.gmra.mrb[0].mxu0 %v52_v25 }
 0x11c   :  { %v235_v27 = vpop.f32.mrb[0].mxu0 }
 0x11d   :  { %v161_v28 = vadd.f32 %v235_v27, %v182_v26  ;;  %v135_v29 = vpop.f32.mrb[1].mxu0 }
 0x11e   :  { %v160_v30 = vadd.f32 %v182_v26, %v135_v29 }
 0x11f   :  { %163 = vst [vmem:[#allocation8 + $0x8] sm:$0xff] %v161_v28 }
 0x120   :  { %162 = vst [vmem:[#allocation8] sm:$0xff] %v160_v30 }
 0x121   :  { %328 = shalt.err (!%p325_p6)
}
 0x122   :  { %s329_s2 = scalar_lea.hbm %s421_s3, 256 }
 0x123   :  { %p330_p7 = scmp.ne.s32.totalorder %s421_s3, %s329_s2  ;;  %p333_p8 = scmp.lt.u32.totalorder %s329_s2, %s421_s3 }
 0x125   :  { %p335_p9 = pnand %p333_p8, %p330_p7 }
 0x127   :  { %338 = shalt.err (!%p335_p9)
}
 0x128   :  { %175 = dma.vmem_to_hbm [thread:$0]  %s170_s12, 256, %s421_s3, [#allocation5], %s346_s22, %s346_s22, %s347_s23  }
 0x129   :  { %343 = dma.done.wait [#allocation5], 256  }
 0x12a   :  { %344 = vsyncadd [#allocation5], 4294967040 }
 0x12b   :  { %179 = vsyncpa [#allocation4], 1 }
 0x12c   :  { %180 = vsyncpa [#allocation7], 1 }
 0x12d   :  { %181 = vsyncpa [#allocation5], 1 }

</bundles_post_ra>
